<compile_context>
chip_gen: v6e
topology: v6e:2x2x1
jax: 0.10.0
libtpu: 0.0.40
codegen_flags: <defaults>
</compile_context>

<pallas_src>
import functools

import jax
import jax.numpy as jnp
from jax.experimental import pallas as pl
from jax.experimental.pallas import tpu as pltpu


def _layernorm(x, gamma, beta, eps=1e-5):
    # PyTorch nn.LayerNorm over last dim: biased variance, eps inside sqrt.
    mu = jnp.mean(x, axis=-1, keepdims=True)
    xc = x - mu
    var = jnp.mean(xc * xc, axis=-1, keepdims=True)
    inv = jax.lax.rsqrt(var + eps)
    return xc * inv * gamma + beta


def any_attention_kernel(q_ref, k_ref, v_ref,
                         gq_ref, bq_ref, gk_ref, bk_ref, gv_ref, bv_ref,
                         wq_ref, wk_ref, wv_ref, wp_ref, bp_ref,
                         o_ref, m_ref,
                         *, num_heads, scale, compute_dtype):
    D = q_ref.shape[-1]
    C = D // num_heads

    # ---- k/v side: done once per batch element (first Nq tile), cached ----
    @pl.when(pl.program_id(1) == 0)
    def _():
        kn = _layernorm(k_ref[0], gk_ref[...], bk_ref[...]).astype(compute_dtype)
        vn = _layernorm(v_ref[0], gv_ref[...], bv_ref[...]).astype(compute_dtype)
        k = jnp.dot(kn, wk_ref[...], preferred_element_type=jnp.float32)
        v = jnp.dot(vn, wv_ref[...], preferred_element_type=jnp.float32)
        # NOTE: reference AnyAttention applies NO softmax, so
        #   ((q @ k^T) * scale) @ v @ Wp == q @ (scale * (k^T v) @ Wp) exactly.
        for g in range(num_heads):                      # small static unroll
            kg = k[:, g * C:(g + 1) * C].astype(compute_dtype)
            vg = v[:, g * C:(g + 1) * C].astype(compute_dtype)
            # Contract over Nk directly -- no explicit transpose of k.
            kv = jax.lax.dot_general(kg, vg, (((0,), (0,)), ((), ())),
                                     preferred_element_type=jnp.float32)
            wp_g = wp_ref[g * C:(g + 1) * C, :]         # (C, D) sublane slice
            m_ref[g * C:(g + 1) * C, :] = jnp.dot(
                (scale * kv).astype(compute_dtype), wp_g,
                preferred_element_type=jnp.float32).astype(m_ref.dtype)
        # TODO(synk): mask path not wired (test uses mask=None); reference's
        #   double masked_fill(-inf) then masked_fill(0) nets to zero-fill.
        # TODO(synk): rel_pos is an arbitrary user callable -> no Pallas equivalent.

    # ---- q side: per Nq tile ----------------------------------------------
    qn = _layernorm(q_ref[0], gq_ref[...], bq_ref[...]).astype(compute_dtype)
    q = jnp.dot(qn, wq_ref[...], preferred_element_type=jnp.float32)
    out = jnp.dot(q.astype(compute_dtype), m_ref[...],
                  preferred_element_type=jnp.float32) + bp_ref[...]
    o_ref[0] = out.astype(o_ref.dtype)


def _apply_pos(t, pos, num_heads):
    if pos is None:
        return t
    if t.ndim != pos.ndim:
        B, N, D = t.shape
        t4 = t.reshape(B, N, num_heads, D // num_heads) + pos
        return t4.reshape(B, N, D)
    return t + pos


def any_attention(params, q, k, v, qpos=None, kpos=None, *, num_heads,
                  compute_dtype=jnp.float32, q_block=256):
    B, Nq, D = q.shape
    Nk = k.shape[1]
    scale = (D / num_heads) ** (-0.5)

    # apply_pos glue (elementwise add / None passthrough)
    q = _apply_pos(q, qpos, num_heads)
    k = _apply_pos(k, kpos, num_heads)

    tq = min(q_block, Nq)
    grid = (B, pl.cdiv(Nq, tq))

    # Only MXU operands are downcast; LayerNorm params/math and bias stay fp32.
    wq = params["wq"].astype(compute_dtype)
    wk = params["wk"].astype(compute_dtype)
    wv = params["wv"].astype(compute_dtype)
    wp = params["wp"].astype(compute_dtype)

    spec_q = pl.BlockSpec((1, tq, D), lambda b, t: (b, t, 0))
    spec_kv = pl.BlockSpec((1, Nk, D), lambda b, t: (b, 0, 0))  # constant over t -> no re-DMA
    spec_vec = pl.BlockSpec((1, D), lambda b, t: (0, 0))
    spec_mat = pl.BlockSpec((D, D), lambda b, t: (0, 0))

    kernel = functools.partial(any_attention_kernel, num_heads=num_heads,
                               scale=scale, compute_dtype=compute_dtype)

    # TODO(synk): for D < 128 the output store is lane-masked (vst.msk); a
    #   wrapper-side re-layout to a >=128-lane slab would remove that, but it
    #   is unnecessary at real model widths (D >= 128).
    return pl.pallas_call(
        kernel,
        out_shape=jax.ShapeDtypeStruct((B, Nq, D), jnp.float32),
        grid_spec=pltpu.PrefetchScalarGridSpec(
            num_scalar_prefetch=0,
            grid=grid,
            in_specs=[spec_q, spec_kv, spec_kv,
                      spec_vec, spec_vec, spec_vec, spec_vec, spec_vec, spec_vec,
                      spec_mat, spec_mat, spec_mat, spec_mat, spec_vec],
            out_specs=spec_q,
            scratch_shapes=[pltpu.VMEM((D, D), compute_dtype)]),
        compiler_params=pltpu.CompilerParams(
            dimension_semantics=("parallel", "arbitrary"),
            vmem_limit_bytes=32 * 1024 * 1024),
    )(q, k, v,
      params["gq"], params["bq"], params["gk"], params["bk"],
      params["gv"], params["bv"],
      wq, wk, wv, wp, params["bp"])


def _reference(params, q, k, v, qpos, kpos, num_heads):
    """Pure-JAX mirror of the PyTorch forward (non-reassociated), sanity check."""
    D = q.shape[-1]
    C = D // num_heads
    scale = (D / num_heads) ** (-0.5)
    q = _apply_pos(q, qpos, num_heads)
    k = _apply_pos(k, kpos, num_heads)
    qn = _layernorm(q, params["gq"][0], params["bq"][0])
    kn = _layernorm(k, params["gk"][0], params["bk"][0])
    vn = _layernorm(v, params["gv"][0], params["bv"][0])
    q = qn @ params["wq"]
    k = kn @ params["wk"]
    v = vn @ params["wv"]
    B, Nq, _ = q.shape
    Nk = k.shape[1]
    qh = q.reshape(B, Nq, num_heads, C)
    kh = k.reshape(B, Nk, num_heads, C)
    vh = v.reshape(B, Nk, num_heads, C)
    attn = jnp.einsum('bqgc,bkgc->bqgk', qh, kh) * scale
    out = jnp.einsum('bqgk,bkgc->bqgc', attn, vh).reshape(B, Nq, D)
    return out @ params["wp"] + params["bp"][0]


if __name__ == "__main__":
    B, Nq, Nk, D, G = 2, 8, 8, 32, 4

    key = jax.random.PRNGKey(0)
    ks = jax.random.split(key, 16)

    q = jax.random.normal(ks[0], (B, Nq, D), jnp.float32)
    k = jax.random.normal(ks[1], (B, Nk, D), jnp.float32)
    v = jax.random.normal(ks[2], (B, Nk, D), jnp.float32)
    qpos = 0.1 * jax.random.normal(ks[3], (B, Nq, G, D // G), jnp.float32)  # head-shaped pos
    kpos = 0.1 * jax.random.normal(ks[4], (B, Nk, D), jnp.float32)           # same-shape pos

    # Deterministic parameter init (synthetic; shapes from the module __init__).
    # nn.Linear weights are (out, in) in PyTorch; we store them transposed (in, out).
    params = {
        "gq": 1.0 + 0.1 * jax.random.normal(ks[5], (1, D), jnp.float32),
        "bq": 0.1 * jax.random.normal(ks[6], (1, D), jnp.float32),
        "gk": 1.0 + 0.1 * jax.random.normal(ks[7], (1, D), jnp.float32),
        "bk": 0.1 * jax.random.normal(ks[8], (1, D), jnp.float32),
        "gv": 1.0 + 0.1 * jax.random.normal(ks[9], (1, D), jnp.float32),
        "bv": 0.1 * jax.random.normal(ks[10], (1, D), jnp.float32),
        "wq": 0.1 * jax.random.normal(ks[11], (D, D), jnp.float32),
        "wk": 0.1 * jax.random.normal(ks[12], (D, D), jnp.float32),
        "wv": 0.1 * jax.random.normal(ks[13], (D, D), jnp.float32),
        "wp": 0.1 * jax.random.normal(ks[14], (D, D), jnp.float32),
        "bp": 0.1 * jax.random.normal(ks[15], (1, D), jnp.float32),
    }

    ref = _reference(params, q, k, v, qpos, kpos, G)

    # fp32 MXU path: must match the (non-reassociated) reference tightly.
    out = any_attention(params, q, k, v, qpos=qpos, kpos=kpos, num_heads=G)
    out = jax.block_until_ready(out)
    assert out.shape == (B, Nq, D)
    assert jnp.allclose(out, ref, atol=1e-4, rtol=1e-4), "fp32 mismatch vs JAX reference"

    # bf16 MXU operands (fp32 accumulation) for v6e/v7x throughput: loose check.
    out_bf16 = any_attention(params, q, k, v, qpos=qpos, kpos=kpos, num_heads=G,
                             compute_dtype=jnp.bfloat16)
    out_bf16 = jax.block_until_ready(out_bf16)
    assert jnp.allclose(out_bf16, ref, atol=5e-2, rtol=5e-2), "bf16 mismatch vs JAX reference"

    print("KERNEL_OK")
</pallas_src>

<mosaic_0001>
module attributes {stable_mosaic.version = 11 : i64} {
  func.func @any_attention_kernel(%arg0: i32, %arg1: i32, %arg2: memref<1x8x32xf32, #tpu.memory_space<vmem>>, %arg3: memref<1x8x32xf32, #tpu.memory_space<vmem>>, %arg4: memref<1x8x32xf32, #tpu.memory_space<vmem>>, %arg5: memref<1x32xf32, #tpu.memory_space<vmem>>, %arg6: memref<1x32xf32, #tpu.memory_space<vmem>>, %arg7: memref<1x32xf32, #tpu.memory_space<vmem>>, %arg8: memref<1x32xf32, #tpu.memory_space<vmem>>, %arg9: memref<1x32xf32, #tpu.memory_space<vmem>>, %arg10: memref<1x32xf32, #tpu.memory_space<vmem>>, %arg11: memref<32x32xf32, #tpu.memory_space<vmem>>, %arg12: memref<32x32xf32, #tpu.memory_space<vmem>>, %arg13: memref<32x32xf32, #tpu.memory_space<vmem>>, %arg14: memref<32x32xf32, #tpu.memory_space<vmem>>, %arg15: memref<1x32xf32, #tpu.memory_space<vmem>>, %arg16: memref<1x8x32xf32, #tpu.memory_space<vmem>>, %arg17: memref<32x32xf32, #tpu.memory_space<vmem>>) attributes {dimension_semantics = [#tpu.dimension_semantics<parallel>, #tpu.dimension_semantics<arbitrary>], iteration_bounds = array<i64: 2, 1>, scalar_prefetch = 0 : i64, scratch_operands = 1 : i64, tpu.core_type = #tpu.core_type<tc>, window_params = [{transform_indices = @transform_0, window_bounds = array<i64: 1, 8, 32>}, {transform_indices = @transform_1, window_bounds = array<i64: 1, 8, 32>}, {transform_indices = @transform_2, window_bounds = array<i64: 1, 8, 32>}, {pipeline_mode = #tpu.pipeline_mode<synchronous>, transform_indices = @transform_3, window_bounds = array<i64: 1, 32>}, {pipeline_mode = #tpu.pipeline_mode<synchronous>, transform_indices = @transform_4, window_bounds = array<i64: 1, 32>}, {pipeline_mode = #tpu.pipeline_mode<synchronous>, transform_indices = @transform_5, window_bounds = array<i64: 1, 32>}, {pipeline_mode = #tpu.pipeline_mode<synchronous>, transform_indices = @transform_6, window_bounds = array<i64: 1, 32>}, {pipeline_mode = #tpu.pipeline_mode<synchronous>, transform_indices = @transform_7, window_bounds = array<i64: 1, 32>}, {pipeline_mode = #tpu.pipeline_mode<synchronous>, transform_indices = @transform_8, window_bounds = array<i64: 1, 32>}, {pipeline_mode = #tpu.pipeline_mode<synchronous>, transform_indices = @transform_9, window_bounds = array<i64: 32, 32>}, {pipeline_mode = #tpu.pipeline_mode<synchronous>, transform_indices = @transform_10, window_bounds = array<i64: 32, 32>}, {pipeline_mode = #tpu.pipeline_mode<synchronous>, transform_indices = @transform_11, window_bounds = array<i64: 32, 32>}, {pipeline_mode = #tpu.pipeline_mode<synchronous>, transform_indices = @transform_12, window_bounds = array<i64: 32, 32>}, {pipeline_mode = #tpu.pipeline_mode<synchronous>, transform_indices = @transform_13, window_bounds = array<i64: 1, 32>}, {transform_indices = @transform_14, window_bounds = array<i64: 1, 8, 32>}]} {
    %c0_i32 = arith.constant 0 : i32
    %0 = arith.cmpi eq, %arg1, %c0_i32 : i32
    %1 = arith.extui %0 : i1 to i32
    %c0_i32_0 = arith.constant 0 : i32
    %2 = arith.cmpi ne, %1, %c0_i32_0 : i32
    scf.if %2 {
      %c0_22 = arith.constant 0 : index
      %c0_23 = arith.constant 0 : index
      %c0_24 = arith.constant 0 : index
      %37 = vector.load %arg3[%c0_22, %c0_23, %c0_24] : memref<1x8x32xf32, #tpu.memory_space<vmem>>, vector<1x8x32xf32>
      %38 = vector.shape_cast %37 : vector<1x8x32xf32> to vector<8x32xf32>
      %c0_25 = arith.constant 0 : index
      %c0_26 = arith.constant 0 : index
      %39 = vector.load %arg7[%c0_25, %c0_26] : memref<1x32xf32, #tpu.memory_space<vmem>>, vector<1x32xf32>
      %c0_27 = arith.constant 0 : index
      %c0_28 = arith.constant 0 : index
      %40 = vector.load %arg8[%c0_27, %c0_28] : memref<1x32xf32, #tpu.memory_space<vmem>>, vector<1x32xf32>
      %cst_29 = arith.constant dense<0.000000e+00> : vector<8xf32>
      %41 = vector.multi_reduction <add>, %38, %cst_29 [1] : vector<8x32xf32> to vector<8xf32>
      %42 = vector.shape_cast %41 : vector<8xf32> to vector<8x1xf32>
      %cst_30 = arith.constant 3.200000e+01 : f32
      %43 = vector.broadcast %cst_30 : f32 to vector<8x1xf32>
      %44 = arith.divf %42, %43 : vector<8x1xf32>
      %45 = vector.broadcast %44 : vector<8x1xf32> to vector<8x32xf32>
      %46 = arith.subf %38, %45 : vector<8x32xf32>
      %47 = arith.mulf %46, %46 : vector<8x32xf32>
      %cst_31 = arith.constant dense<0.000000e+00> : vector<8xf32>
      %48 = vector.multi_reduction <add>, %47, %cst_31 [1] : vector<8x32xf32> to vector<8xf32>
      %49 = vector.shape_cast %48 : vector<8xf32> to vector<8x1xf32>
      %cst_32 = arith.constant 3.200000e+01 : f32
      %50 = vector.broadcast %cst_32 : f32 to vector<8x1xf32>
      %51 = arith.divf %49, %50 : vector<8x1xf32>
      %cst_33 = arith.constant 9.99999974E-6 : f32
      %52 = vector.broadcast %cst_33 : f32 to vector<8x1xf32>
      %53 = arith.addf %51, %52 : vector<8x1xf32>
      %54 = math.rsqrt %53 : vector<8x1xf32>
      %55 = vector.broadcast %54 : vector<8x1xf32> to vector<8x32xf32>
      %56 = arith.mulf %46, %55 : vector<8x32xf32>
      %57 = vector.broadcast %39 : vector<1x32xf32> to vector<8x32xf32>
      %58 = arith.mulf %56, %57 : vector<8x32xf32>
      %59 = vector.broadcast %40 : vector<1x32xf32> to vector<8x32xf32>
      %60 = arith.addf %58, %59 : vector<8x32xf32>
      %c0_34 = arith.constant 0 : index
      %c0_35 = arith.constant 0 : index
      %c0_36 = arith.constant 0 : index
      %61 = vector.load %arg4[%c0_34, %c0_35, %c0_36] : memref<1x8x32xf32, #tpu.memory_space<vmem>>, vector<1x8x32xf32>
      %62 = vector.shape_cast %61 : vector<1x8x32xf32> to vector<8x32xf32>
      %c0_37 = arith.constant 0 : index
      %c0_38 = arith.constant 0 : index
      %63 = vector.load %arg9[%c0_37, %c0_38] : memref<1x32xf32, #tpu.memory_space<vmem>>, vector<1x32xf32>
      %c0_39 = arith.constant 0 : index
      %c0_40 = arith.constant 0 : index
      %64 = vector.load %arg10[%c0_39, %c0_40] : memref<1x32xf32, #tpu.memory_space<vmem>>, vector<1x32xf32>
      %cst_41 = arith.constant dense<0.000000e+00> : vector<8xf32>
      %65 = vector.multi_reduction <add>, %62, %cst_41 [1] : vector<8x32xf32> to vector<8xf32>
      %66 = vector.shape_cast %65 : vector<8xf32> to vector<8x1xf32>
      %cst_42 = arith.constant 3.200000e+01 : f32
      %67 = vector.broadcast %cst_42 : f32 to vector<8x1xf32>
      %68 = arith.divf %66, %67 : vector<8x1xf32>
      %69 = vector.broadcast %68 : vector<8x1xf32> to vector<8x32xf32>
      %70 = arith.subf %62, %69 : vector<8x32xf32>
      %71 = arith.mulf %70, %70 : vector<8x32xf32>
      %cst_43 = arith.constant dense<0.000000e+00> : vector<8xf32>
      %72 = vector.multi_reduction <add>, %71, %cst_43 [1] : vector<8x32xf32> to vector<8xf32>
      %73 = vector.shape_cast %72 : vector<8xf32> to vector<8x1xf32>
      %cst_44 = arith.constant 3.200000e+01 : f32
      %74 = vector.broadcast %cst_44 : f32 to vector<8x1xf32>
      %75 = arith.divf %73, %74 : vector<8x1xf32>
      %cst_45 = arith.constant 9.99999974E-6 : f32
      %76 = vector.broadcast %cst_45 : f32 to vector<8x1xf32>
      %77 = arith.addf %75, %76 : vector<8x1xf32>
      %78 = math.rsqrt %77 : vector<8x1xf32>
      %79 = vector.broadcast %78 : vector<8x1xf32> to vector<8x32xf32>
      %80 = arith.mulf %70, %79 : vector<8x32xf32>
      %81 = vector.broadcast %63 : vector<1x32xf32> to vector<8x32xf32>
      %82 = arith.mulf %80, %81 : vector<8x32xf32>
      %83 = vector.broadcast %64 : vector<1x32xf32> to vector<8x32xf32>
      %84 = arith.addf %82, %83 : vector<8x32xf32>
      %c0_46 = arith.constant 0 : index
      %c0_47 = arith.constant 0 : index
      %85 = vector.load %arg12[%c0_46, %c0_47] : memref<32x32xf32, #tpu.memory_space<vmem>>, vector<32x32xf32>
      %cst_48 = arith.constant dense<0.000000e+00> : vector<8x32xf32>
      %86 = tpu.matmul %60, %85, %cst_48 {dimension_numbers = #tpu.dot_dimension_numbers<[1], [0], [0], [1], [0, 0, 1, 1], [], []>} : vector<8x32xf32>, vector<32x32xf32>, vector<8x32xf32> -> vector<8x32xf32>
      %c0_49 = arith.constant 0 : index
      %c0_50 = arith.constant 0 : index
      %87 = vector.load %arg13[%c0_49, %c0_50] : memref<32x32xf32, #tpu.memory_space<vmem>>, vector<32x32xf32>
      %cst_51 = arith.constant dense<0.000000e+00> : vector<8x32xf32>
      %88 = tpu.matmul %84, %87, %cst_51 {dimension_numbers = #tpu.dot_dimension_numbers<[1], [0], [0], [1], [0, 0, 1, 1], [], []>} : vector<8x32xf32>, vector<32x32xf32>, vector<8x32xf32> -> vector<8x32xf32>
      %89 = vector.extract_strided_slice %86 {offsets = [0, 0], sizes = [8, 8], strides = [1, 1]} : vector<8x32xf32> to vector<8x8xf32>
      %90 = vector.extract_strided_slice %88 {offsets = [0, 0], sizes = [8, 8], strides = [1, 1]} : vector<8x32xf32> to vector<8x8xf32>
      %cst_52 = arith.constant dense<0.000000e+00> : vector<8x8xf32>
      %91 = tpu.matmul %89, %90, %cst_52 {dimension_numbers = #tpu.dot_dimension_numbers<[0], [0], [1], [1], [0, 1, 1, 1], [], []>} : vector<8x8xf32>, vector<8x8xf32>, vector<8x8xf32> -> vector<8x8xf32>
      %c0_53 = arith.constant 0 : index
      %c0_54 = arith.constant 0 : index
      %92 = vector.load %arg14[%c0_53, %c0_54] : memref<32x32xf32, #tpu.memory_space<vmem>>, vector<8x32xf32>
      %cst_55 = arith.constant 0.353553385 : f32
      %93 = vector.broadcast %cst_55 : f32 to vector<8x8xf32>
      %94 = arith.mulf %93, %91 : vector<8x8xf32>
      %cst_56 = arith.constant dense<0.000000e+00> : vector<8x32xf32>
      %95 = tpu.matmul %94, %92, %cst_56 {dimension_numbers = #tpu.dot_dimension_numbers<[1], [0], [0], [1], [0, 0, 1, 1], [], []>} : vector<8x8xf32>, vector<8x32xf32>, vector<8x32xf32> -> vector<8x32xf32>
      %c0_57 = arith.constant 0 : index
      %c0_58 = arith.constant 0 : index
      %96 = vector.load %arg17[%c0_57, %c0_58] : memref<32x32xf32, #tpu.memory_space<vmem>>, vector<8x32xf32>
      tpu.vector_store %arg17[%c0_57, %c0_58], %95 {strides = array<i32>} : memref<32x32xf32, #tpu.memory_space<vmem>>, vector<8x32xf32>,
      %97 = vector.extract_strided_slice %86 {offsets = [0, 8], sizes = [8, 8], strides = [1, 1]} : vector<8x32xf32> to vector<8x8xf32>
      %98 = vector.extract_strided_slice %88 {offsets = [0, 8], sizes = [8, 8], strides = [1, 1]} : vector<8x32xf32> to vector<8x8xf32>
      %cst_59 = arith.constant dense<0.000000e+00> : vector<8x8xf32>
      %99 = tpu.matmul %97, %98, %cst_59 {dimension_numbers = #tpu.dot_dimension_numbers<[0], [0], [1], [1], [0, 1, 1, 1], [], []>} : vector<8x8xf32>, vector<8x8xf32>, vector<8x8xf32> -> vector<8x8xf32>
      %c8 = arith.constant 8 : index
      %c0_60 = arith.constant 0 : index
      %100 = vector.load %arg14[%c8, %c0_60] : memref<32x32xf32, #tpu.memory_space<vmem>>, vector<8x32xf32>
      %cst_61 = arith.constant 0.353553385 : f32
      %101 = vector.broadcast %cst_61 : f32 to vector<8x8xf32>
      %102 = arith.mulf %101, %99 : vector<8x8xf32>
      %cst_62 = arith.constant dense<0.000000e+00> : vector<8x32xf32>
      %103 = tpu.matmul %102, %100, %cst_62 {dimension_numbers = #tpu.dot_dimension_numbers<[1], [0], [0], [1], [0, 0, 1, 1], [], []>} : vector<8x8xf32>, vector<8x32xf32>, vector<8x32xf32> -> vector<8x32xf32>
      %c8_63 = arith.constant 8 : index
      %c0_64 = arith.constant 0 : index
      %104 = vector.load %arg17[%c8_63, %c0_64] : memref<32x32xf32, #tpu.memory_space<vmem>>, vector<8x32xf32>
      tpu.vector_store %arg17[%c8_63, %c0_64], %103 {strides = array<i32>} : memref<32x32xf32, #tpu.memory_space<vmem>>, vector<8x32xf32>,
      %105 = vector.extract_strided_slice %86 {offsets = [0, 16], sizes = [8, 8], strides = [1, 1]} : vector<8x32xf32> to vector<8x8xf32>
      %106 = vector.extract_strided_slice %88 {offsets = [0, 16], sizes = [8, 8], strides = [1, 1]} : vector<8x32xf32> to vector<8x8xf32>
      %cst_65 = arith.constant dense<0.000000e+00> : vector<8x8xf32>
      %107 = tpu.matmul %105, %106, %cst_65 {dimension_numbers = #tpu.dot_dimension_numbers<[0], [0], [1], [1], [0, 1, 1, 1], [], []>} : vector<8x8xf32>, vector<8x8xf32>, vector<8x8xf32> -> vector<8x8xf32>
      %c16 = arith.constant 16 : index
      %c0_66 = arith.constant 0 : index
      %108 = vector.load %arg14[%c16, %c0_66] : memref<32x32xf32, #tpu.memory_space<vmem>>, vector<8x32xf32>
      %cst_67 = arith.constant 0.353553385 : f32
      %109 = vector.broadcast %cst_67 : f32 to vector<8x8xf32>
      %110 = arith.mulf %109, %107 : vector<8x8xf32>
      %cst_68 = arith.constant dense<0.000000e+00> : vector<8x32xf32>
      %111 = tpu.matmul %110, %108, %cst_68 {dimension_numbers = #tpu.dot_dimension_numbers<[1], [0], [0], [1], [0, 0, 1, 1], [], []>} : vector<8x8xf32>, vector<8x32xf32>, vector<8x32xf32> -> vector<8x32xf32>
      %c16_69 = arith.constant 16 : index
      %c0_70 = arith.constant 0 : index
      %112 = vector.load %arg17[%c16_69, %c0_70] : memref<32x32xf32, #tpu.memory_space<vmem>>, vector<8x32xf32>
      tpu.vector_store %arg17[%c16_69, %c0_70], %111 {strides = array<i32>} : memref<32x32xf32, #tpu.memory_space<vmem>>, vector<8x32xf32>,
      %113 = vector.extract_strided_slice %86 {offsets = [0, 24], sizes = [8, 8], strides = [1, 1]} : vector<8x32xf32> to vector<8x8xf32>
      %114 = vector.extract_strided_slice %88 {offsets = [0, 24], sizes = [8, 8], strides = [1, 1]} : vector<8x32xf32> to vector<8x8xf32>
      %cst_71 = arith.constant dense<0.000000e+00> : vector<8x8xf32>
      %115 = tpu.matmul %113, %114, %cst_71 {dimension_numbers = #tpu.dot_dimension_numbers<[0], [0], [1], [1], [0, 1, 1, 1], [], []>} : vector<8x8xf32>, vector<8x8xf32>, vector<8x8xf32> -> vector<8x8xf32>
      %c24 = arith.constant 24 : index
      %c0_72 = arith.constant 0 : index
      %116 = vector.load %arg14[%c24, %c0_72] : memref<32x32xf32, #tpu.memory_space<vmem>>, vector<8x32xf32>
      %cst_73 = arith.constant 0.353553385 : f32
      %117 = vector.broadcast %cst_73 : f32 to vector<8x8xf32>
      %118 = arith.mulf %117, %115 : vector<8x8xf32>
      %cst_74 = arith.constant dense<0.000000e+00> : vector<8x32xf32>
      %119 = tpu.matmul %118, %116, %cst_74 {dimension_numbers = #tpu.dot_dimension_numbers<[1], [0], [0], [1], [0, 0, 1, 1], [], []>} : vector<8x8xf32>, vector<8x32xf32>, vector<8x32xf32> -> vector<8x32xf32>
      %c24_75 = arith.constant 24 : index
      %c0_76 = arith.constant 0 : index
      %120 = vector.load %arg17[%c24_75, %c0_76] : memref<32x32xf32, #tpu.memory_space<vmem>>, vector<8x32xf32>
      tpu.vector_store %arg17[%c24_75, %c0_76], %119 {strides = array<i32>} : memref<32x32xf32, #tpu.memory_space<vmem>>, vector<8x32xf32>,
    } else {
    }
    %c0 = arith.constant 0 : index
    %c0_1 = arith.constant 0 : index
    %c0_2 = arith.constant 0 : index
    %3 = vector.load %arg2[%c0, %c0_1, %c0_2] : memref<1x8x32xf32, #tpu.memory_space<vmem>>, vector<1x8x32xf32>
    %4 = vector.shape_cast %3 : vector<1x8x32xf32> to vector<8x32xf32>
    %c0_3 = arith.constant 0 : index
    %c0_4 = arith.constant 0 : index
    %5 = vector.load %arg5[%c0_3, %c0_4] : memref<1x32xf32, #tpu.memory_space<vmem>>, vector<1x32xf32>
    %c0_5 = arith.constant 0 : index
    %c0_6 = arith.constant 0 : index
    %6 = vector.load %arg6[%c0_5, %c0_6] : memref<1x32xf32, #tpu.memory_space<vmem>>, vector<1x32xf32>
    %cst = arith.constant dense<0.000000e+00> : vector<8xf32>
    %7 = vector.multi_reduction <add>, %4, %cst [1] : vector<8x32xf32> to vector<8xf32>
    %8 = vector.shape_cast %7 : vector<8xf32> to vector<8x1xf32>
    %cst_7 = arith.constant 3.200000e+01 : f32
    %9 = vector.broadcast %cst_7 : f32 to vector<8x1xf32>
    %10 = arith.divf %8, %9 : vector<8x1xf32>
    %11 = vector.broadcast %10 : vector<8x1xf32> to vector<8x32xf32>
    %12 = arith.subf %4, %11 : vector<8x32xf32>
    %13 = arith.mulf %12, %12 : vector<8x32xf32>
    %cst_8 = arith.constant dense<0.000000e+00> : vector<8xf32>
    %14 = vector.multi_reduction <add>, %13, %cst_8 [1] : vector<8x32xf32> to vector<8xf32>
    %15 = vector.shape_cast %14 : vector<8xf32> to vector<8x1xf32>
    %cst_9 = arith.constant 3.200000e+01 : f32
    %16 = vector.broadcast %cst_9 : f32 to vector<8x1xf32>
    %17 = arith.divf %15, %16 : vector<8x1xf32>
    %cst_10 = arith.constant 9.99999974E-6 : f32
    %18 = vector.broadcast %cst_10 : f32 to vector<8x1xf32>
    %19 = arith.addf %17, %18 : vector<8x1xf32>
    %20 = math.rsqrt %19 : vector<8x1xf32>
    %21 = vector.broadcast %20 : vector<8x1xf32> to vector<8x32xf32>
    %22 = arith.mulf %12, %21 : vector<8x32xf32>
    %23 = vector.broadcast %5 : vector<1x32xf32> to vector<8x32xf32>
    %24 = arith.mulf %22, %23 : vector<8x32xf32>
    %25 = vector.broadcast %6 : vector<1x32xf32> to vector<8x32xf32>
    %26 = arith.addf %24, %25 : vector<8x32xf32>
    %c0_11 = arith.constant 0 : index
    %c0_12 = arith.constant 0 : index
    %27 = vector.load %arg11[%c0_11, %c0_12] : memref<32x32xf32, #tpu.memory_space<vmem>>, vector<32x32xf32>
    %cst_13 = arith.constant dense<0.000000e+00> : vector<8x32xf32>
    %28 = tpu.matmul %26, %27, %cst_13 {dimension_numbers = #tpu.dot_dimension_numbers<[1], [0], [0], [1], [0, 0, 1, 1], [], []>} : vector<8x32xf32>, vector<32x32xf32>, vector<8x32xf32> -> vector<8x32xf32>
    %c0_14 = arith.constant 0 : index
    %c0_15 = arith.constant 0 : index
    %29 = vector.load %arg17[%c0_14, %c0_15] : memref<32x32xf32, #tpu.memory_space<vmem>>, vector<32x32xf32>
    %cst_16 = arith.constant dense<0.000000e+00> : vector<8x32xf32>
    %30 = tpu.matmul %28, %29, %cst_16 {dimension_numbers = #tpu.dot_dimension_numbers<[1], [0], [0], [1], [0, 0, 1, 1], [], []>} : vector<8x32xf32>, vector<32x32xf32>, vector<8x32xf32> -> vector<8x32xf32>
    %c0_17 = arith.constant 0 : index
    %c0_18 = arith.constant 0 : index
    %31 = vector.load %arg15[%c0_17, %c0_18] : memref<1x32xf32, #tpu.memory_space<vmem>>, vector<1x32xf32>
    %32 = vector.broadcast %31 : vector<1x32xf32> to vector<8x32xf32>
    %33 = arith.addf %30, %32 : vector<8x32xf32>
    %c0_19 = arith.constant 0 : index
    %c0_20 = arith.constant 0 : index
    %c0_21 = arith.constant 0 : index
    %34 = vector.load %arg16[%c0_19, %c0_20, %c0_21] : memref<1x8x32xf32, #tpu.memory_space<vmem>>, vector<1x8x32xf32>
    %35 = vector.shape_cast %34 : vector<1x8x32xf32> to vector<8x32xf32>
    %36 = vector.shape_cast %33 : vector<8x32xf32> to vector<1x8x32xf32>
    tpu.vector_store %arg16[%c0_19, %c0_20, %c0_21], %36 {strides = array<i32>} : memref<1x8x32xf32, #tpu.memory_space<vmem>>, vector<1x8x32xf32>,
    return
  }
  func.func @transform_0(%arg0: i32, %arg1: i32) -> (i32, i32, i32) {
    %c0_i32 = arith.constant 0 : i32
    %c0_i32_0 = arith.constant 0 : i32
    return %arg0, %arg1, %c0_i32 : i32, i32, i32
  }
  func.func @transform_1(%arg0: i32, %arg1: i32) -> (i32, i32, i32) {
    %c0_i32 = arith.constant 0 : i32
    %c0_i32_0 = arith.constant 0 : i32
    %c0_i32_1 = arith.constant 0 : i32
    return %arg0, %c0_i32, %c0_i32_0 : i32, i32, i32
  }
  func.func @transform_2(%arg0: i32, %arg1: i32) -> (i32, i32, i32) {
    %c0_i32 = arith.constant 0 : i32
    %c0_i32_0 = arith.constant 0 : i32
    %c0_i32_1 = arith.constant 0 : i32
    return %arg0, %c0_i32, %c0_i32_0 : i32, i32, i32
  }
  func.func @transform_3(%arg0: i32, %arg1: i32) -> (i32, i32) {
    %c0_i32 = arith.constant 0 : i32
    %c0_i32_0 = arith.constant 0 : i32
    %c0_i32_1 = arith.constant 0 : i32
    return %c0_i32, %c0_i32_0 : i32, i32
  }
  func.func @transform_4(%arg0: i32, %arg1: i32) -> (i32, i32) {
    %c0_i32 = arith.constant 0 : i32
    %c0_i32_0 = arith.constant 0 : i32
    %c0_i32_1 = arith.constant 0 : i32
    return %c0_i32, %c0_i32_0 : i32, i32
  }
  func.func @transform_5(%arg0: i32, %arg1: i32) -> (i32, i32) {
    %c0_i32 = arith.constant 0 : i32
    %c0_i32_0 = arith.constant 0 : i32
    %c0_i32_1 = arith.constant 0 : i32
    return %c0_i32, %c0_i32_0 : i32, i32
  }
  func.func @transform_6(%arg0: i32, %arg1: i32) -> (i32, i32) {
    %c0_i32 = arith.constant 0 : i32
    %c0_i32_0 = arith.constant 0 : i32
    %c0_i32_1 = arith.constant 0 : i32
    return %c0_i32, %c0_i32_0 : i32, i32
  }
  func.func @transform_7(%arg0: i32, %arg1: i32) -> (i32, i32) {
    %c0_i32 = arith.constant 0 : i32
    %c0_i32_0 = arith.constant 0 : i32
    %c0_i32_1 = arith.constant 0 : i32
    return %c0_i32, %c0_i32_0 : i32, i32
  }
  func.func @transform_8(%arg0: i32, %arg1: i32) -> (i32, i32) {
    %c0_i32 = arith.constant 0 : i32
    %c0_i32_0 = arith.constant 0 : i32
    %c0_i32_1 = arith.constant 0 : i32
    return %c0_i32, %c0_i32_0 : i32, i32
  }
  func.func @transform_9(%arg0: i32, %arg1: i32) -> (i32, i32) {
    %c0_i32 = arith.constant 0 : i32
    %c0_i32_0 = arith.constant 0 : i32
    %c0_i32_1 = arith.constant 0 : i32
    return %c0_i32, %c0_i32_0 : i32, i32
  }
  func.func @transform_10(%arg0: i32, %arg1: i32) -> (i32, i32) {
    %c0_i32 = arith.constant 0 : i32
    %c0_i32_0 = arith.constant 0 : i32
    %c0_i32_1 = arith.constant 0 : i32
    return %c0_i32, %c0_i32_0 : i32, i32
  }
  func.func @transform_11(%arg0: i32, %arg1: i32) -> (i32, i32) {
    %c0_i32 = arith.constant 0 : i32
    %c0_i32_0 = arith.constant 0 : i32
    %c0_i32_1 = arith.constant 0 : i32
    return %c0_i32, %c0_i32_0 : i32, i32
  }
  func.func @transform_12(%arg0: i32, %arg1: i32) -> (i32, i32) {
    %c0_i32 = arith.constant 0 : i32
    %c0_i32_0 = arith.constant 0 : i32
    %c0_i32_1 = arith.constant 0 : i32
    return %c0_i32, %c0_i32_0 : i32, i32
  }
  func.func @transform_13(%arg0: i32, %arg1: i32) -> (i32, i32) {
    %c0_i32 = arith.constant 0 : i32
    %c0_i32_0 = arith.constant 0 : i32
    %c0_i32_1 = arith.constant 0 : i32
    return %c0_i32, %c0_i32_0 : i32, i32
  }
  func.func @transform_14(%arg0: i32, %arg1: i32) -> (i32, i32, i32) {
    %c0_i32 = arith.constant 0 : i32
    %c0_i32_0 = arith.constant 0 : i32
    return %arg0, %arg1, %c0_i32 : i32, i32, i32
  }
}

</mosaic_0001>

<bundles_post_ra>
// kernel: tpu_custom_call.1
= control target key start
LH: loop header
LB: loop body
LE: loop exit
PB: predicated region body
PF: predicated region fallthrough
CT: control target
= control target key end

     0   :  { %s2986_s0 = inlined_call_operand.hbm [shape: f32[2,8,32], index: 0, kind: input, shape index: {}]   ;;  %s2987_s1 = inlined_call_operand.hbm [shape: f32[2,8,32], index: 1, kind: input, shape index: {}]   ;;  %s2988_s2 = inlined_call_operand.hbm [shape: f32[2,8,32], index: 2, kind: input, shape index: {}]   ;;  %s2989_s3 = inlined_call_operand.vmem [shape: f32[1,32], index: 3, kind: input, shape index: {}]   ;;  %s2990_s4 = inlined_call_operand.vmem [shape: f32[1,32], index: 4, kind: input, shape index: {}]   ;;  %s2991_s5 = inlined_call_operand.vmem [shape: f32[1,32], index: 5, kind: input, shape index: {}]   ;;  %s2992_s6 = inlined_call_operand.vmem [shape: f32[1,32], index: 6, kind: input, shape index: {}]   ;;  %s2993_s7 = inlined_call_operand.vmem [shape: f32[1,32], index: 7, kind: input, shape index: {}]   ;;  %s2994_s8 = inlined_call_operand.vmem [shape: f32[1,32], index: 8, kind: input, shape index: {}]   ;;  %s2995_s9 = inlined_call_operand.hbm [shape: f32[32,32], index: 9, kind: input, shape index: {}]   ;;  %s2996_s10 = inlined_call_operand.hbm [shape: f32[32,32], index: 10, kind: input, shape index: {}]   ;;  %s2997_s11 = inlined_call_operand.hbm [shape: f32[32,32], index: 11, kind: input, shape index: {}]   ;;  %s2998_s12 = inlined_call_operand.hbm [shape: f32[32,32], index: 12, kind: input, shape index: {}]   ;;  %s2999_s13 = inlined_call_operand.vmem [shape: f32[1,32], index: 13, kind: input, shape index: {}]   ;;  %s3000_s14 = inlined_call_operand.hbm [shape: f32[2,8,32], index: 14, kind: output, shape index: {}]  }
   0x1   :  { %3019 = sst [smem:[#allocation29_spill]] %s2987_s1 }
   0x2   :  { %3020 = sst [smem:[#allocation30_spill]] %s2989_s3 }
   0x3   :  { %3021 = sst [smem:[#allocation31_spill]] %s2990_s4 }
   0x4   :  { %3022 = sst [smem:[#allocation32_spill]] %s2995_s9 }
   0x5   :  { %3023 = sst [smem:[#allocation33_spill]] %s2996_s10 }
   0x6   :  { %3024 = sst [smem:[#allocation34_spill]] %s2997_s11 }
   0x7   :  { %3025 = sst [smem:[#allocation35_spill]] %s2999_s13 }
   0x8   :  { %3026 = sst [smem:[#allocation36_spill]] %s3000_s14 }
   0x9   :  { %19 = vsyncpa [#allocation4], 0 }
   0xa   :  { %21 = vsyncpa [#allocation4 + $0x1], 0 }
   0xb   :  { %22 = vsyncpa [#allocation7], 0 }
   0xc   :  { %24 = vsyncpa [#allocation7 + $0x1], 0 }
   0xd   :  { %25 = vsyncpa [#allocation10], 0 }
   0xe   :  { %26 = vsyncpa [#allocation13], 0 }
   0xf   :  { %27 = vsyncpa [#allocation5], 0 }
  0x10   :  { %29 = vsyncpa [#allocation5 + $0x1], 0  ;;  %s2628_s29 = smov 0   ;;  %s2630_s30 = smov 0  }
  0x11   :  { %s2632_s15 = smov 0   ;;  %s2634_s16 = smov 0  }
  0x12   :  { %s2636_s17 = smov 0   ;;  %s2638_s18 = smov 0  }
  0x13 LB: > { %3027 = sst [smem:[#allocation21_spill]] %s2516_s29  ;;  %s2659_s19 = sadd.s32 4294967295, %s2536_s18   ;;  %s2536_s18 = sphi %s2638_s18, %s35_s18   ;;  %s2532_s17 = sphi %s2636_s17, %s3071_s17   ;;  %s2528_s16 = sphi %s2634_s16, %s3070_s16   ;;  %s2524_s15 = sphi %s2632_s15, %s3074_s15   ;;  %s2520_s30 = sphi %s2630_s30, %s3073_s30   ;;  %s2516_s29 = sphi %s2628_s29, %s3072_s29  }
  0x14   : > { %3028 = sst [smem:[#allocation22_spill]] %s2528_s16  ;;  %p1966_p0 = scmp.ge.s32.totalorder %s2536_s18, 1 }
  0x15   : > { %3029 = sst [smem:[#allocation23_spill]] %s2532_s17  ;;  %p3015_p1 = scmp.eq.s32.totalorder %s2659_s19, 0 }
  0x16   : > { %3030 = sst [smem:[#allocation24_spill]] %s2536_s18  ;;  %p391_p2 = scmp.lt.s32.totalorder %s2536_s18, 3 }
  0x17   : > { %s2538_s21 = smov [#allocation9]   ;;  %s2539_s24 = smov [#allocation12]  }
  0x18   : > { %p2664_p3 = pnand %p1966_p0, %p391_p2  ;;  %s421_s22 = sshll.u32 %s2538_s21, 4  ;;  %s422_s22 = int_to_ptr.vmem [resolvable:$true] %s421_s22 }
  0x19   : > { %s447_s25 = sshll.u32 %s2539_s24, 4  ;;  %s2267_s26 = scalar_lea.vmem %s422_s22, 512  ;;  %s448_s25 = int_to_ptr.vmem [resolvable:$true] %s447_s25 }
  0x1a   : > { %p2154_p4 = pneg %p2664_p3  ;;  %p2268_p8 = scmp.ne.s32.totalorder %s422_s22, %s2267_s26 }
  0x1b   : > { %p2275_p11 = scmp.lt.s32.totalorder %s422_s22, %s422_s22  ;;  %p2276_p12 = scmp.lt.s32.totalorder %s2267_s26, %s2267_s26 }
  0x1c   : > { %p2673_p6 = pnand %p2154_p4, %p3015_p1 }
  0x1d   : > { %p2277_p13 = por %p2276_p12, %p2275_p11 }
  0x1e   : > { %p3016_p7 = pneg %p2673_p6 }
  0x20   : > { %p2270_p9 = pnand %p2268_p8, %p3016_p7 }
  0x22   : > { %p2271_p10 = pneg %p2270_p9 }
  0x24   : > { %p2278_p0 = pnand %p2277_p13, %p2271_p10 }
  0x26   : > { %2281 = shalt.err (!%p2278_p0)
}
  0x27   : > { %s3002_s27 = smov 128   ;;  %s3004_s28 = smov 8  }
  0x28   : > { %s3033_s9 = sld [smem:[#allocation32_spill]]  ;;  %s2293_s14 = scalar_lea.vmem %s448_s25, 512 }
  0x29   : > { %p2294_p2 = scmp.ne.s32.totalorder %s448_s25, %s2293_s14  ;;  %p2301_p9 = scmp.lt.s32.totalorder %s448_s25, %s448_s25 }
  0x2a   : > { %p2302_p10 = scmp.lt.s32.totalorder %s2293_s14, %s2293_s14 }
  0x2b   : > { %p2296_p4 = pnand %p2294_p2, %p3016_p7 }
  0x2c   : > { %p2303_p11 = por %p2302_p10, %p2301_p9 }
  0x2d   : > { %p2297_p8 = pneg %p2296_p4 }
  0x2e   : > { %2157 = dma.hbm_to_vmem [thread:$0]  (!%p2673_p6), %s3033_s9, 512, %s422_s22, [#allocation10], %s3002_s27, %s3002_s27, %s3004_s28  }
  0x2f   : > { %p2304_p12 = pnand %p2303_p11, %p2297_p8 }
  0x31   : > { %2307 = shalt.err (!%p2304_p12)
}
  0x32   : > { %s3034_s11 = sld [smem:[#allocation34_spill]]  ;;  %s1965_s14 = sadd.s32 4294967294, %s2536_s18  }
  0x33   : > { %s47_s22 = sadd.s32 1, %s2532_s17  ;;  %s56_s21 = sadd.s32 1, %s2524_s15 }
  0x34   : > { %p49_p13 = scmp.ge.s32.totalorder %s47_s22, 2  ;;  %p63_p0 = scmp.ne.s32.totalorder %s2524_s15, %s2520_s30 }
  0x35   : > { %p64_p2 = scmp.eq.s32.totalorder %s2536_s18, 0  ;;  %p69_p8 = scmp.ne.s32.totalorder %s2520_s30, %s2516_s29 }
  0x36   : > { %s3076_s22 = smov (%p49_p13, %s47_s22), 0  ;;  %p378_p9 = scmp.eq.s32.totalorder %s2659_s19, 1 }
  0x37   : > { %3035 = sst [smem:[#allocation25_spill]] %s3076_s22  ;;  %p2709_p4 = por %p64_p2, %p63_p0 }
  0x38   : > { %2163 = dma.hbm_to_vmem [thread:$0]  (!%p2673_p6), %s3034_s11, 512, %s448_s25, [#allocation13], %s3002_s27, %s3002_s27, %s3004_s28  }
  0x39   : > { %s51_s25 = ssub.s32 %s2532_s17, %s3076_s22  ;;  %p2720_p11 = por %p3015_p1, %p69_p8 }
  0x3a   : > { %p54_p10 = scmp.eq.s32.totalorder %s51_s25, 0  ;;  %p2724_p12 = por %p378_p9, %p63_p0 }
  0x3b   : > { %p384_p13 = scmp.eq.s32.totalorder %s1965_s14, 1  ;;  %p2185_p5 = scmp.lt.s32.totalorder %s2536_s18, 2 }
  0x3c   : > { %s3038_s26 = scalar_select %p2724_p12, 1, 0 }
  0x3d   : > { %s2729_s27 = scalar_select %p54_p10, %s2524_s15, %s56_s21  }
  0x3e   : > { %3039 = sst [smem:[#allocation26_spill]] %s3038_s26  ;;  %p2731_p2 = por %p384_p13, %p69_p8 }
  0x3f   : > { %3040 = sst [smem:[#allocation27_spill]] %s2729_s27  ;;  %s3012_s9 = sand.u32 1, %s2524_s15  }
  0x40   : > { %s3041_s28 = scalar_select %p2731_p2, 1, 0 }
  0x41   : > { %s2738_s11 = sshll.u32 %s2532_s17, 7  ;;  %s2742_s25 = sshll.u32 %s3012_s9, 3 }
  0x42   : > { %3042 = sst [smem:[#allocation28_spill]] %s3041_s28  ;;  %p2746_p0 = pnand %p2185_p5, %p2709_p4 }
  0x43   : > { %s496_s14 = sand.u32 1, %s2536_s18   ;;  %s3044_s1 = sld [smem:[#allocation29_spill]] }
  0x44   : > { %s500_s29 = scalar_lea.vmem [#allocation6], %s2742_s25  ;;  %s2756_s26 = scalar_lea.sflag [#allocation7], %s496_s14 }
  0x45   : > { %s507_s17 = sshll.u32 %s500_s29, 4  ;;  %p3017_p8 = pneg %p2746_p0  ;;  %s508_s17 = int_to_ptr.vmem [resolvable:$true] %s507_s17 }
  0x46   : > { %s2321_s13 = scalar_lea.vmem %s508_s17, 128  ;;  %s2542_s9 = smov [#allocation6]  }
  0x47   : > { %p2322_p9 = scmp.ne.s32.totalorder %s508_s17, %s2321_s13  ;;  %s2326_s16 = sshll.u32 %s2542_s9, 4  ;;  %s2327_s16 = int_to_ptr.vmem [resolvable:$false] %s2326_s16 }
  0x48   : > { %s2328_s18 = scalar_lea.vmem %s2327_s16, 256  ;;  %p2329_p10 = scmp.lt.s32.totalorder %s508_s17, %s2327_s16 }
  0x49   : > { %s505_s28 = scalar_lea.hbm %s3044_s1, %s2738_s11  ;;  %p2324_p5 = pnand %p2322_p9, %p3017_p8 }
  0x4a   : > { %p2330_p13 = scmp.lt.s32.totalorder %s2328_s18, %s2321_s13 }
  0x4b   : > { %p2325_p4 = pneg %p2324_p5 }
  0x4c   : > { %p2331_p1 = por %p2330_p13, %p2329_p10 }
  0x4e   : > { %p2332_p7 = pnand %p2331_p1, %p2325_p4 }
  0x50   : > { %2335 = shalt.err (!%p2332_p7)
}
  0x51   : > { %2173 = dma.hbm_to_vmem [thread:$0]  (!%p2746_p0), %s505_s28, 128, %s508_s17, %s2756_s26  }
  0x52   : > { %s2543_s29 = smov [#allocation11]   ;;  %s2544_s14 = smov [#allocation14]  }
  0x53   : > { %s434_s27 = sshll.u32 %s2543_s29, 4  ;;  %s460_s21 = sshll.u32 %s2544_s14, 4  ;;  %s435_s27 = int_to_ptr.vmem [resolvable:$true] %s434_s27  ;;  %s461_s21 = int_to_ptr.vmem [resolvable:$true] %s460_s21 }
  0x54   : > { %s2347_s1 = scalar_lea.vmem %s435_s27, 512  ;;  %p3045_p5 = pneg %p2673_p6 }
  0x55   : > { %p2348_p9 = scmp.ne.s32.totalorder %s435_s27, %s2347_s1  ;;  %p2355_p12 = scmp.lt.s32.totalorder %s435_s27, %s435_s27 }
  0x56   : > { %p2356_p10 = scmp.lt.s32.totalorder %s2347_s1, %s2347_s1 }
  0x57   : > { %p2350_p8 = pnand %p2348_p9, %p3045_p5 }
  0x58   : > { %p2357_p1 = por %p2356_p10, %p2355_p12 }
  0x59   : > { %p2351_p2 = pneg %p2350_p8 }
  0x5b   : > { %p2358_p7 = pnand %p2357_p1, %p2351_p2 }
  0x5d   : > { %2361 = shalt.err (!%p2358_p7)
}
  0x5e   : > { %s3046_s9 = smov 8   ;;  %s3047_s16 = smov 128  }
  0x5f   : > { %s3048_s10 = sld [smem:[#allocation33_spill]]  ;;  %s2373_s28 = scalar_lea.vmem %s461_s21, 512 }
  0x60   : > { %p2374_p4 = scmp.ne.s32.totalorder %s461_s21, %s2373_s28  ;;  %p3049_p8 = pmov %p3045_p5 }
  0x61   : > { %p2381_p12 = scmp.lt.s32.totalorder %s461_s21, %s461_s21  ;;  %p2382_p2 = scmp.lt.s32.totalorder %s2373_s28, %s2373_s28 }
  0x62   : > { %p2376_p13 = pnand %p2374_p4, %p3049_p8 }
  0x63   : > { %p2383_p5 = por %p2382_p2, %p2381_p12 }
  0x64   : > { %p2377_p9 = pneg %p2376_p13 }
  0x65   : > { %2160 = dma.hbm_to_vmem [thread:$0]  (!%p2673_p6), %s3048_s10, 512, %s435_s27, [#allocation10], %s3047_s16, %s3047_s16, %s3046_s9  }
  0x66   : > { %p2384_p10 = pnand %p2383_p5, %p2377_p9 }
  0x68   : > { %2387 = shalt.err (!%p2384_p10)
}
  0x69   : > { %2166 = dma.hbm_to_vmem [thread:$0]  (!%p2673_p6), %s2998_s12, 512, %s461_s21, [#allocation13], %s3047_s16, %s3047_s16, %s3046_s9  }
  0x6a   : > { %s487_s14 = scalar_lea.hbm %s2986_s0, %s2738_s11  ;;  %s481_s17 = scalar_lea.vmem [#allocation3], %s2742_s25 }
  0x6b   : > { %s489_s18 = sshll.u32 %s481_s17, 4  ;;  %s523_s10 = scalar_lea.hbm %s2988_s2, %s2738_s11  ;;  %s490_s18 = int_to_ptr.vmem [resolvable:$true] %s489_s18 }
  0x6c   : > { %s3050_s4 = sand.u32 1, %s2524_s15   ;;  %s2401_s1 = scalar_lea.vmem %s490_s18, 128 }
  0x6d   : > { %s478_s3 = scalar_lea.sflag [#allocation4], %s3050_s4  ;;  %p2402_p1 = scmp.ne.s32.totalorder %s490_s18, %s2401_s1 }
  0x6e   : > { %p3051_p7 = pneg %p2746_p0  ;;  %s2545_s21 = smov [#allocation3]  }
  0x6f   : > { %s2406_s9 = sshll.u32 %s2545_s21, 4  ;;  %s2407_s9 = int_to_ptr.vmem [resolvable:$false] %s2406_s9 }
  0x70   : > { %p2404_p4 = pnand %p2402_p1, %p3051_p7  ;;  %s2408_s16 = scalar_lea.vmem %s2407_s9, 256 }
  0x71   : > { %p2409_p6 = scmp.lt.s32.totalorder %s490_s18, %s2407_s9  ;;  %p2410_p13 = scmp.lt.s32.totalorder %s2408_s16, %s2401_s1 }
  0x72   : > { %p2405_p8 = pneg %p2404_p4 }
  0x73   : > { %p2411_p9 = por %p2410_p13, %p2409_p6 }
  0x75   : > { %p2412_p12 = pnand %p2411_p9, %p2405_p8 }
  0x77   : > { %2415 = shalt.err (!%p2412_p12)
}
  0x78   : > { %2170 = dma.hbm_to_vmem [thread:$0]  (!%p2746_p0), %s487_s14, 128, %s490_s18, %s478_s3  }
  0x79   : > { %s518_s4 = scalar_lea.vmem [#allocation8], %s2742_s25  ;;  %p3052_p5 = pmov %p3051_p7 }
  0x7a   : > { %s525_s13 = sshll.u32 %s518_s4, 4  ;;  %s2546_s27 = smov [#allocation8]   ;;  %s526_s13 = int_to_ptr.vmem [resolvable:$true] %s525_s13 }
  0x7b   : > { %s2429_s29 = scalar_lea.vmem %s526_s13, 128  ;;  %s2434_s17 = sshll.u32 %s2546_s27, 4  ;;  %s2435_s17 = int_to_ptr.vmem [resolvable:$false] %s2434_s17 }
  0x7c   : > { %p2430_p2 = scmp.ne.s32.totalorder %s526_s13, %s2429_s29  ;;  %s2436_s23 = scalar_lea.vmem %s2435_s17, 256 }
  0x7d   : > { %p2437_p7 = scmp.lt.s32.totalorder %s526_s13, %s2435_s17  ;;  %p2438_p4 = scmp.lt.s32.totalorder %s2436_s23, %s2429_s29 }
  0x7e   : > { %p2432_p10 = pnand %p2430_p2, %p3052_p5 }
  0x7f   : > { %p2439_p8 = por %p2438_p4, %p2437_p7 }
  0x80   : > { %p2433_p1 = pneg %p2432_p10 }
  0x82   : > { %p2440_p6 = pnand %p2439_p8, %p2433_p1 }
  0x84   : > { %2443 = shalt.err (!%p2440_p6)
}
  0x85   : > { %2176 = dma.hbm_to_vmem [thread:$0]  (!%p2746_p0), %s523_s10, 128, %s526_s13, %s2756_s26  }
  0x86   : > { %534 = sbr.rel (%p2664_p3) target bundleno = 1524 (0x5f4), region = 76  ;;  %s2819_s14 = sand.u32 (!%p2664_p3), 1, %s2520_s30  }
  0x87   : > { %s2822_s18 = sshll.u32 (!%p2664_p3), %s2819_s14, 3  ;;  %s537_s22 = scalar_lea.sflag (!%p2664_p3), [#allocation4], %s2819_s14 }
  0x88   : > { %s540_s28 = scalar_lea.vmem (!%p2664_p3), [#allocation3], %s2822_s18 }
  0x8b   : > { %2495 = dma.done.wait (%p2720_p11), %s537_s22, 128  }
  0x8c   : > { %2497 = vsyncadd (%p2720_p11), %s537_s22, 4294967168  ;;  %s545_s10 = sand.u32 1, %s2659_s19   ;;  %s549_s20 = scalar_lea.vmem [#allocation6], %s2822_s18 }
  0x8d   : > { %s546_s11 = scalar_lea.sflag [#allocation7], %s545_s10 }
  0x8e   : > { %2499 = dma.done.wait (%p2720_p11), %s546_s11, 256  }
  0x8f   : > { %2501 = vsyncadd (%p2720_p11), %s546_s11, 4294967040  ;;  %s558_s26 = scalar_lea.vmem [#allocation8], %s2822_s18  ;;  %p3053_p3 = scmp.eq.s32.totalorder %s2659_s19, 0 }
  0x91   : > { %2503 = dma.done.wait (%p3053_p3), [#allocation10], 1024   ;;  %p3054_p0 = pmov %p3053_p3 }
  0x93   : > { %2505 = vsyncadd (%p3054_p0), [#allocation10], 4294966272  ;;  %p3055_p13 = pmov %p3054_p0 }
  0x94   : > { %p3056_p9 = pmov %p3054_p0 }
  0x95   : > { %2507 = dma.done.wait (%p3055_p13), [#allocation13], 1024  }
  0x96   : > { %2509 = vsyncadd (%p3056_p9), [#allocation13], 4294966272  ;;  %vm636_vm0 = vcmask 261120   ;;  %v633_v0 = vld [vmem:[%s549_s20] sm:$0xff]  ;;  %v665_v1 = vld [vmem:[%s558_s26] sm:$0xff]  ;;  %v2547_v15 = vmov 0.0  }
  0x97   : > { %v637_v2 = vsel %vm636_vm0, %v633_v0, 0.0  ;;  %v668_v3 = vsel %vm636_vm0, %v665_v1, 0.0  ;;  %v698_v14 = vld [vmem:[#allocation11 + $0x18] sm:$0xff]  ;;  %2046 = vmatprep.subr.mxu0 %v2547_v15  ;;  %v697_v16 = vld [vmem:[#allocation11 + $0x10] sm:$0xff]  ;;  %2057 = vmatprep.subr.mxu1 %v2547_v15  ;;  %v696_v19 = vld [vmem:[#allocation11 + $0x8] sm:$0xff]  ;;  %vm2548_vm1 = vmmov 0  }
  0x98   : > { %638 = vadd.xlane.f32.xlu0 %v637_v2  ;;  %v775_v17 = vld [vmem:[#allocation12 + $0x18] sm:$0xff]  ;;  %2047 = vmatpush3.msra.mxu0 %v698_v14  ;;  %v774_v18 = vld [vmem:[#allocation12 + $0x10] sm:$0xff]  ;;  %v695_v20 = vld [vmem:[#allocation11] sm:$0xff]  ;;  %s2549_s29 = smov 120   ;;  %s2550_s27 = smov 112   ;;  %vm881_vm2 = vcmask 64512  }
  0x99   : > { %2058 = vmatpush3.msra.mxu1 %v775_v17  ;;  %2048 = vmatprep.subr.mxu0 %v2547_v15  ;;  %v773_v21 = vld [vmem:[#allocation12 + $0x8] sm:$0xff]  ;;  %v772_v22 = vld [vmem:[#allocation12] sm:$0xff]  ;;  %v1987_v30 = vld [vmem:[%s2991_s5] ss:$0 sm:$0xff]  ;;  %s2551_s17 = smov 104   ;;  %s3057_s25 = sld [smem:[#allocation30_spill]] }
  0x9a   : > { %2059 = vmatprep.subr.mxu1 %v2547_v15  ;;  %2049 = vmatpush3.msra.mxu0 %v697_v16  ;;  %v1988_v32 = vld [vmem:[%s2992_s6] ss:$0 sm:$0xff]  ;;  %v955_v53 = vld [vmem:[#allocation14] sm:$0xff]  ;;  %v1629_v63 = vld [vmem:[#allocation9 + $0x18] sm:$0xff]  ;;  %s3058_s10 = sld [smem:[#allocation31_spill]]  ;;  %s628_s21 = scalar_lea.vmem [#allocation15], %s2822_s18 }
  0x9b   : > { %2054 = vmatprep.mubr.msk.f32.mxu0 %vm2548_vm1, %v2547_v15  ;;  %2050 = vmatprep.subr.mxu0 %v2547_v15  ;;  %v1989_v35 = vld [vmem:[%s2993_s7] ss:$0 sm:$0xff]  ;;  %v1626_v2 = vld [vmem:[#allocation9] sm:$0xff]  ;;  %s3059_s11 = sld [smem:[#allocation22_spill]]  ;;  %s1803_s9 = sshll.u32 %s628_s21, 4  ;;  %s1804_s9 = int_to_ptr.vmem [resolvable:$true] %s1803_s9 }
  0x9c   : > { %669 = vadd.xlane.f32.xlu0 %v668_v3  ;;  %2060 = vmatpush3.msra.mxu1 %v774_v18  ;;  %v1990_v38 = vld [vmem:[%s2994_s8] ss:$0 sm:$0xff]  ;;  %s3060_s20 = sld [smem:[#allocation26_spill]]  ;;  %s2552_s23 = smov [#allocation15]  }
  0x9d   : > { %2051 = vmatpush3.msra.mxu0 %v696_v19  ;;  %2061 = vmatprep.subr.mxu1 %v2547_v15  ;;  %v1594_v50 = vld [vmem:[%s540_s28] sm:$0xff]  ;;  %s3061_s24 = sld [smem:[#allocation35_spill]]  ;;  %s2448_s18 = sshll.u32 %s2552_s23, 4  ;;  %s2449_s18 = int_to_ptr.vmem [resolvable:$false] %s2448_s18 }
  0x9e   : > { %2052 = vmatprep.subr.mxu0 %v2547_v15  ;;  %2065 = vmatprep.mubr.msk.f32.mxu1 %vm2548_vm1, %v2547_v15  ;;  %v1598_v52 = vsel %vm636_vm0, %v1594_v50, 0.0  ;;  %s3062_s13 = sld [smem:[#allocation36_spill]]  ;;  %s2450_s3 = scalar_lea.vmem %s2449_s18, 256 }
  0x9f   : > { %2053 = vmatpush3.msra.mxu0 %v695_v20  ;;  %2062 = vmatpush3.msra.mxu1 %v773_v21  ;;  %p2451_p10 = scmp.lt.s32.totalorder %s1804_s9, %s2449_s18 }
  0xa0   : > { %2068 = vmatprep.subr.mxu0 %v2547_v15  ;;  %2063 = vmatprep.subr.mxu1 %v2547_v15 }
  0xa1   : > { %2064 = vmatpush3.msra.mxu1 %v772_v22  ;;  %s2007_s1 = sshll.u32 %s3059_s11, 7 }
  0xa2   : > { %2073 = vmatprep.subr.mxu1 %v2547_v15  ;;  %p3063_p12 = scmp.ne.s32.totalorder %s3060_s20, 0 }
 0x121   : > { %v639_v4 = vpop.xlane.xlu0 %638 }
 0x122   : > { %v641_v5 = vmul.f32 0.03125, %v639_v4 }
 0x124   : > { %v642_v6 = vsub.f32 %v633_v0, %v641_v5  ;;  %v1628_v0 = vld [vmem:[#allocation9 + $0x10] sm:$0xff]  ;;  %v1144_v5 = vld [vmem:[#allocation14 + $0x8] sm:$0xff] }
 0x125   : > { %v670_v7 = vpop.xlane.xlu0 %669 }
 0x126   : > { %v671_v8 = vmul.f32 0.03125, %v670_v7  ;;  %v643_v9 = vmul.f32 %v642_v6, %v642_v6 }
 0x128   : > { %v672_v10 = vsub.f32 %v665_v1, %v671_v8  ;;  %v644_v11 = vsel %vm636_vm0, %v643_v9, 0.0  ;;  %v1627_v1 = vld [vmem:[#allocation9 + $0x8] sm:$0xff]  ;;  %v1331_v9 = vld [vmem:[#allocation14 + $0x10] sm:$0xff] }
 0x129   : > { %645 = vadd.xlane.f32.xlu1 %v644_v11 }
 0x12a   : > { %v673_v12 = vmul.f32 %v672_v10, %v672_v10 }
 0x12c   : > { %v674_v13 = vsel %vm636_vm0, %v673_v12, 0.0 }
 0x12d   : > { %675 = vadd.xlane.f32.xlu1 %v674_v13  ;;  %v1518_v13 = vld [vmem:[#allocation14 + $0x18] sm:$0xff] }
 0x1b2   : > { %v646_v23 = vpop.xlane.xlu1 %645 }
 0x1b3   : > { %v647_v24 = vmul.f32 0.03125, %v646_v23  ;;  %v2001_v23 = vld [vmem:[%s3057_s25] ss:$0 sm:$0xff] }
 0x1b5   : > { %v648_v25 = vadd.f32 1e-05, %v647_v24 }
 0x1b6   : > { %v676_v26 = vpop.xlane.xlu1 %675 }
 0x1b7   : > { %2250 = vrsqrt.f32 %v648_v25  ;;  %v677_v27 = vmul.f32 0.03125, %v676_v26  ;;  %v2002_v25 = vld [vmem:[%s3058_s10] ss:$0 sm:$0xff] }
 0x1b9   : > { %v678_v28 = vadd.f32 1e-05, %v677_v27 }
 0x1bb   : > { %2252 = vrsqrt.f32 %v678_v28 }
 0x1c4   : > { %v2251_v29 = vpop.eup %2250 }
 0x1c5   : > { %v650_v31 = vmul.f32 %v2251_v29, %v642_v6 }
 0x1c7   : > { %v657_v33 = vmul.f32 %v1987_v30, %v650_v31 }
 0x1c8   : > { %v2253_v34 = vpop.eup %2252 }
 0x1c9   : > { %v664_v36 = vadd.f32 %v1988_v32, %v657_v33  ;;  %v680_v37 = vmul.f32 %v2253_v34, %v672_v10 }
 0x1cb   : > { %2055 = vmatmul.mubr.msk.f32.vlgmr.msra.gmra.mxu0 %vm636_vm0, %v664_v36  ;;  %v687_v39 = vmul.f32 %v1989_v35, %v680_v37 }
 0x1cc   : > { %2070 = vmatprep.mubr.msk.f32.mxu0 %vm2548_vm1, %v2547_v15 }
 0x1cd   : > { %v694_v40 = vadd.f32 %v1990_v38, %v687_v39 }
 0x1cf   : > { %2066 = vmatmul.mubr.msk.f32.vlgmr.msra.gmra.mxu1 %vm636_vm0, %v694_v40 }
 0x1d0   : > { %2075 = vmatprep.mubr.msk.f32.mxu1 %vm2548_vm1, %v2547_v15  ;;  %2074 = vmatpush3.msra.mxu1 %v955_v53 }
 0x1d1   : > { %2083 = vmatprep.subr.mxu1 %v2547_v15 }
 0x28b   : > { %v768_v41 = vpop.f32.mrf.mxu0 }
 0x28c   : > { %1032 = vrot.lane.b32.xlu0 %v768_v41, %s2549_s29  ;;  %1220 = vrot.lane.b32.xlu1 %v768_v41, %s2550_s27 }
 0x28d   : > { %v2056_v42 = vpop.f32.mrf.mxu0 }
 0x28e   : > { %v2004_v42 = vld [vmem:[%s3061_s24] ss:$0 sm:$0xff] }
 0x28f   : > { %v845_v43 = vpop.f32.mrf.mxu1 }
 0x290   : > { %1407 = vrot.lane.b32.xlu1 %v768_v41, %s2551_s17  ;;  %1255 = vrot.lane.b32.xlu0 %v845_v43, %s2550_s27  ;;  %s1789_s27 = scalar_lea.sflag [#allocation5], %s2819_s14 }
 0x291   : > { %2069 = vmatpush3.msra.mxu0 %v845_v43  ;;  %v2067_v44 = vpop.f32.mrf.mxu1 }
 0x292   : > { %2078 = vmatprep.subr.mxu0 %v2547_v15 }
 0x294   : > { %1068 = vrot.lane.b32.xlu1 %v845_v43, %s2549_s29  ;;  %s2943_s29 = scalar_lea.hbm %s3062_s13, %s2007_s1 }
 0x298   : > { %1442 = vrot.lane.b32.xlu1 %v845_v43, %s2551_s17  ;;  %s2444_s17 = scalar_lea.vmem %s1804_s9, 128 }
 0x299   : > { %p2445_p11 = scmp.ne.s32.totalorder %s1804_s9, %s2444_s17  ;;  %p2452_p1 = scmp.lt.s32.totalorder %s2450_s3, %s2444_s17 }
 0x29b   : > { %p2446_p2 = pnand %p2445_p11, %p3063_p12  ;;  %p2453_p7 = por %p2452_p1, %p2451_p10 }
 0x29d   : > { %p2447_p5 = pneg %p2446_p2 }
 0x29f   : > { %p2454_p4 = pnand %p2453_p7, %p2447_p5 }
 0x2ae   : > { %849 = vxpose.xlu0.b32.start.end [1/1] (short) (narrow) %v768_v41, 8 }
 0x2fe   : > { %v1221_v45 = vpop.permute.xlu1 %1220  ;;  %v1033_v46 = vpop.permute.xlu0 %1032 }
 0x2ff   : > { %1223 = vxpose.xlu0.b32.start.end [1/1] (short) (narrow) %v1221_v45, 8  ;;  %1035 = vxpose.xlu1.b32.start.end [1/1] (short) (narrow) %v1033_v46, 8 }
 0x302   : > { %v1408_v47 = vpop.permute.xlu1 %1407  ;;  %v1256_v48 = vpop.permute.xlu0 %1255 }
 0x303   : > { %1410 = vxpose.xlu0.b32.start.end [1/1] (short) (narrow) %v1408_v47, 8 }
 0x306   : > { %v1069_v51 = vpop.permute.xlu1 %1068 }
 0x30a   : > { %v1443_v54 = vpop.permute.xlu1 %1442 }
 0x32a   : > { %v865_v49 = vpop.trf.xlu0 }
 0x32b   : > { %2071 = vmatmul.mubr.msk.f32.vlgmr.msra.gmra.mxu0 %vm881_vm2, %v865_v49 }
 0x32c   : > { %2079 = vmatpush3.msra.mxu0 %v1069_v51  ;;  %2080 = vmatprep.mubr.msk.f32.mxu0 %vm2548_vm1, %v2547_v15 }
 0x32d   : > { %2088 = vmatprep.subr.mxu0 %v2547_v15 }
 0x330   : > { %1599 = vadd.xlane.f32.xlu0 %v1598_v52 }
 0x37b   : > { %v1051_v55 = vpop.trf.xlu1  ;;  %v1239_v56 = vpop.trf.xlu0 }
 0x37c   : > { %2081 = vmatmul.mubr.msk.f32.vlgmr.msra.gmra.mxu0 %vm881_vm2, %v1051_v55 }
 0x37d   : > { %2089 = vmatpush3.msra.mxu0 %v1256_v48  ;;  %2090 = vmatprep.mubr.msk.f32.mxu0 %vm2548_vm1, %v2547_v15 }
 0x37e   : > { %2098 = vmatprep.subr.mxu0 %v2547_v15 }
 0x37f   : > { %v1426_v57 = vpop.trf.xlu0 }
 0x380   : > { %2091 = vmatmul.mubr.msk.f32.vlgmr.msra.gmra.mxu0 %vm881_vm2, %v1239_v56 }
 0x381   : > { %2099 = vmatpush3.msra.mxu0 %v1443_v54  ;;  %2100 = vmatprep.mubr.msk.f32.mxu0 %vm2548_vm1, %v2547_v15 }
 0x382   : > { %2108 = vmatprep.subr.mxu0 %v2547_v15 }
 0x384   : > { %2101 = vmatmul.mubr.msk.f32.vlgmr.msra.gmra.mxu0 %vm881_vm2, %v1426_v57 }
 0x385   : > { %2116 = vmatprep.mubr.msk.f32.mxu0 %vm2548_vm1, %v2547_v15  ;;  %2109 = vmatpush3.msra.mxu0 %v1629_v63 }
 0x386   : > { %2110 = vmatprep.subr.mxu0 %v2547_v15 }
 0x387   : > { %2111 = vmatpush3.msra.mxu0 %v1628_v0 }
 0x388   : > { %2112 = vmatprep.subr.mxu0 %v2547_v15 }
 0x389   : > { %2113 = vmatpush3.msra.mxu0 %v1627_v1 }
 0x38a   : > { %2114 = vmatprep.subr.mxu0 %v2547_v15 }
 0x38b   : > { %2115 = vmatpush3.msra.mxu0 %v1626_v2 }
 0x3b9   : > { %v1600_v58 = vpop.xlane.xlu0 %1599 }
 0x3ba   : > { %v1602_v59 = vmul.f32 0.03125, %v1600_v58 }
 0x3bc   : > { %v1603_v60 = vsub.f32 %v1594_v50, %v1602_v59 }
 0x3be   : > { %v1604_v61 = vmul.f32 %v1603_v60, %v1603_v60 }
 0x3c0   : > { %v1605_v62 = vsel %vm636_vm0, %v1604_v61, 0.0 }
 0x3c1   : > { %1606 = vadd.xlane.f32.xlu1 %v1605_v62 }
 0x3eb   : > { %v951_v3 = vpop.f32.mrf.mxu0 }
 0x3ec   : > { %v956_v4 = vmul.f32 0.35355338, %v951_v3 }
 0x3ed   : > { %v2072_v6 = vpop.f32.mrf.mxu0 }
 0x3ee   : > { %2076 = vmatmul.mubr.msk.f32.vlgmr.msra.gmra.mxu1 %vm881_vm2, %v956_v4 }
 0x3ef   : > { %2084 = vmatpush3.msra.mxu1 %v1144_v5  ;;  %2085 = vmatprep.mubr.msk.f32.mxu1 %vm2548_vm1, %v2547_v15 }
 0x3f0   : > { %2093 = vmatprep.subr.mxu1 %v2547_v15 }
 0x43c   : > { %v1140_v7 = vpop.f32.mrf.mxu0 }
 0x43d   : > { %v1145_v8 = vmul.f32 0.35355338, %v1140_v7 }
 0x43e   : > { %v2082_v10 = vpop.f32.mrf.mxu0 }
 0x43f   : > { %2086 = vmatmul.mubr.msk.f32.vlgmr.msra.gmra.mxu1 %vm881_vm2, %v1145_v8 }
 0x440   : > { %v1327_v11 = vpop.f32.mrf.mxu0  ;;  %2094 = vmatpush3.msra.mxu1 %v1331_v9  ;;  %2095 = vmatprep.mubr.msk.f32.mxu1 %vm2548_vm1, %v2547_v15 }
 0x441   : > { %v1332_v12 = vmul.f32 0.35355338, %v1327_v11  ;;  %2103 = vmatprep.subr.mxu1 %v2547_v15 }
 0x442   : > { %v2092_v14 = vpop.f32.mrf.mxu0 }
 0x443   : > { %2096 = vmatmul.mubr.msk.f32.vlgmr.msra.gmra.mxu1 %vm881_vm2, %v1332_v12 }
 0x444   : > { %v1514_v16 = vpop.f32.mrf.mxu0  ;;  %2104 = vmatpush3.msra.mxu1 %v1518_v13  ;;  %2105 = vmatprep.mubr.msk.f32.mxu1 %vm2548_vm1, %v2547_v15 }
 0x445   : > { %v1519_v17 = vmul.f32 0.35355338, %v1514_v16  ;;  %2119 = vmatprep.subr.mxu1 %v2547_v15 }
 0x446   : > { %v2102_v18 = vpop.f32.mrf.mxu0 }
 0x447   : > { %2106 = vmatmul.mubr.msk.f32.vlgmr.msra.gmra.mxu1 %vm881_vm2, %v1519_v17 }
 0x448   : > { %2127 = vmatprep.mubr.msk.f32.mxu1 %vm2548_vm1, %v2547_v15 }
 0x44a   : > { %v1607_v19 = vpop.xlane.xlu1 %1606 }
 0x44b   : > { %v1608_v20 = vmul.f32 0.03125, %v1607_v19 }
 0x44d   : > { %v1609_v21 = vadd.f32 1e-05, %v1608_v20 }
 0x44f   : > { %2254 = vrsqrt.f32 %v1609_v21 }
 0x45c   : > { %v2255_v22 = vpop.eup %2254 }
 0x45d   : > { %v1611_v24 = vmul.f32 %v2255_v22, %v1603_v60 }
 0x45f   : > { %v1618_v26 = vmul.f32 %v2001_v23, %v1611_v24 }
 0x461   : > { %v1625_v27 = vadd.f32 %v2002_v25, %v1618_v26 }
 0x463   : > { %2117 = vmatmul.mubr.msk.f32.vlgmr.msra.gmra.mxu0 %vm636_vm0, %v1625_v27 }
 0x4ae   : > { %v1026_v28 = vpop.f32.mrf.mxu1 }
 0x4af   : > { %1030 = vst.msk [vmem:[#allocation2] sm:$0xff] %vm636_vm0, %v1026_v28 }
 0x4b0   : > { %v2077_v29 = vpop.f32.mrf.mxu1 }
 0x4b6   : > { %v1703_v39 = vld [vmem:[#allocation2] sm:$0xff] }
 0x4ff   : > { %v1215_v30 = vpop.f32.mrf.mxu1 }
 0x500   : > { %1219 = vst.msk [vmem:[#allocation2 + $0x8] sm:$0xff] %vm636_vm0, %v1215_v30 }
 0x501   : > { %v2087_v31 = vpop.f32.mrf.mxu1 }
 0x503   : > { %v1402_v32 = vpop.f32.mrf.mxu1 }
 0x504   : > { %1406 = vst.msk [vmem:[#allocation2 + $0x10] sm:$0xff] %vm636_vm0, %v1402_v32 }
 0x505   : > { %v2097_v33 = vpop.f32.mrf.mxu1 }
 0x507   : > { %v1589_v34 = vpop.f32.mrf.mxu1  ;;  %v1704_v38 = vld [vmem:[#allocation2 + $0x8] sm:$0xff] }
 0x508   : > { %1593 = vst.msk [vmem:[#allocation2 + $0x18] sm:$0xff] %vm636_vm0, %v1589_v34 }
 0x509   : > { %v2107_v35 = vpop.f32.mrf.mxu1 }
 0x50b   : > { %v1705_v37 = vld [vmem:[#allocation2 + $0x10] sm:$0xff] }
 0x50f   : > { %v1706_v36 = vld [vmem:[#allocation2 + $0x18] sm:$0xff] }
 0x510   : > { %2120 = vmatpush3.msra.mxu1 %v1706_v36 }
 0x511   : > { %2121 = vmatprep.subr.mxu1 %v2547_v15 }
 0x512   : > { %2122 = vmatpush3.msra.mxu1 %v1705_v37 }
 0x513   : > { %2123 = vmatprep.subr.mxu1 %v2547_v15 }
 0x514   : > { %2124 = vmatpush3.msra.mxu1 %v1704_v38 }
 0x515   : > { %2125 = vmatprep.subr.mxu1 %v2547_v15 }
 0x516   : > { %2126 = vmatpush3.msra.mxu1 %v1703_v39 }
 0x523   : > { %v1699_v40 = vpop.f32.mrf.mxu0 }
 0x524   : > { %2128 = vmatmul.mubr.msk.f32.vlgmr.msra.gmra.mxu1 %vm636_vm0, %v1699_v40 }
 0x525   : > { %v2118_v41 = vpop.f32.mrf.mxu0 }
 0x5e4   : > { %v1783_v43 = vpop.f32.mrf.mxu1 }
 0x5e5   : > { %v1784_v44 = vadd.f32 %v2004_v42, %v1783_v43 }
 0x5e6   : > { %v2129_v15 = vpop.f32.mrf.mxu1 }
 0x5e7   : > { %1787 = vst.msk [vmem:[%s628_s21] sm:$0xff] %vm636_vm0, %v1784_v44 }
 0x5e8   : > { %2457 = shalt.err (!%p2454_p4)
}
 0x5e9   : > { %s2458_s25 = scalar_lea.hbm %s2943_s29, 128  ;;  %s2462_s28 = scalar_lea.hbm %s3062_s13, 256 }
 0x5ea   : > { %p2459_p8 = scmp.ne.s32.totalorder %s2943_s29, %s2458_s25  ;;  %p2463_p0 = scmp.lt.s32.totalorder %s2943_s29, %s3062_s13 }
 0x5eb   : > { %p2464_p13 = scmp.lt.s32.totalorder %s2462_s28, %s2458_s25 }
 0x5ec   : > { %p2460_p6 = pnand %p2459_p8, %p3063_p12 }
 0x5ed   : > { %p2465_p9 = por %p2464_p13, %p2463_p0 }
 0x5ee   : > { %p2461_p3 = pneg %p2460_p6 }
 0x5f0   : > { %p2466_p11 = pnand %p2465_p9, %p2461_p3 }
 0x5f2   : > { %2469 = shalt.err (!%p2466_p11)
}
 0x5f3   : > { %2152 = dma.vmem_to_hbm [thread:$0]  (%p3063_p12), %s1804_s9, 128, %s2943_s29, %s1789_s27  }
 0x5f4 PF: > { %s3064_s26 = sld [smem:[#allocation21_spill]] }
 0x5f5   : > { %s3065_s19 = sld [smem:[#allocation28_spill]] }
 0x5f6   : > { %s3066_s24 = sld [smem:[#allocation24_spill]] }
 0x5fa   : > { %s1815_s1 = sand.u32 1, %s3064_s26  }
 0x5fb   : > { %p3067_p2 = scmp.ne.s32.totalorder %s3065_s19, 0  ;;  %s1816_s21 = scalar_lea.sflag [#allocation5], %s1815_s1 }
 0x5fc   : > { %p3068_p5 = scmp.ge.s32.totalorder %s3066_s24, 2 }
 0x5fe   : > { %p2178_p10 = pnand %p3068_p5, %p3067_p2 }
 0x600   : > { %p2179_p1 = pneg %p2178_p10 }
 0x602   : > { %2511 = dma.done.wait (%p2179_p1), %s1816_s21, 128  }
 0x603   : > { %2513 = vsyncadd (%p2179_p1), %s1816_s21, 4294967168  ;;  %s35_s18 = sadd.s32 1, %s3066_s24   ;;  %s3069_s20 = sld [smem:[#allocation27_spill]] }
 0x604   : > { %p32_p7 = scmp.ge.s32.totalorder %s35_s18, 4   ;;  %s3070_s16 = sld [smem:[#allocation23_spill]] }
 0x605   : > { %s3071_s17 = sld [smem:[#allocation25_spill]]  ;;  %s3072_s29 = smov %s2520_s30 }
 0x606   : > { %s3073_s30 = smov %s2524_s15  ;;  %34 = sbr.rel (!%p32_p7) target bundleno = 19 (0x13), region = 165 }
 0x609   : > { %s3074_s15 = smov %s3069_s20 }
 0x60b   :  { %1821 = vsyncpa [#allocation4], 1 }
 0x60c   :  { %1823 = vsyncpa [#allocation4 + $0x1], 1 }
 0x60d   :  { %1824 = vsyncpa [#allocation7], 1 }
 0x60e   :  { %1826 = vsyncpa [#allocation7 + $0x1], 1 }
 0x60f   :  { %1827 = vsyncpa [#allocation10], 1 }
 0x610   :  { %1828 = vsyncpa [#allocation13], 1 }
 0x611   :  { %1829 = vsyncpa [#allocation5], 1 }
 0x612   :  { %1831 = vsyncpa [#allocation5 + $0x1], 1 }

</bundles_post_ra>
